<compile_context>
chip_gen: v5e
topology: v5e:2x2
jax: 0.10.0
libtpu: 0.0.40
codegen_flags: <defaults>
</compile_context>

<pallas_src>
import functools

import jax
import jax.numpy as jnp
from jax import lax
from jax.experimental import pallas as pl
from jax.experimental.pallas import tpu as pltpu


def _ce_partial_kernel(logits_ref, targets_ref, out_ref, *, valid_rows):
    """Per-block partial sum of -log_softmax(logits)[target].

    logits_ref : (TB, K)  native dtype, VMEM
    targets_ref: (TB, 1)  int32,        VMEM
    out_ref    : (1, 8, 128) f32,       VMEM (partial sum broadcast to block)
    """
    i = pl.program_id(0)
    x = logits_ref[...].astype(jnp.float32)                      # (TB, K)
    tb, k = x.shape

    # Numerically-stable log-sum-exp along the class (lane) axis.
    m = jnp.max(x, axis=-1, keepdims=True)                       # (TB, 1)
    lse = jnp.log(jnp.sum(jnp.exp(x - m), axis=-1, keepdims=True)) + m

    # Gather the target logit with a fused compare+select (no one-hot mul).
    col_ids = lax.broadcasted_iota(jnp.int32, (tb, k), 1)        # (TB, K)
    picked = jnp.sum(
        jnp.where(col_ids == targets_ref[...], x, 0.0),
        axis=-1, keepdims=True)                                  # (TB, 1)

    nll = lse - picked                                           # (TB, 1)

    # Zero the contribution of padded batch rows.
    row_ids = i * tb + lax.broadcasted_iota(jnp.int32, (tb, 1), 0)
    nll = jnp.where(row_ids < valid_rows, nll, 0.0)

    partial = jnp.sum(nll)                                       # scalar
    out_ref[...] = jnp.broadcast_to(
        partial.reshape(1, 1, 1), out_ref.shape).astype(jnp.float32)


def _round_up(x, m):
    return ((x + m - 1) // m) * m


def cross_entropy_adv_loss(logits, targets, mode="targeted", block_rows=None):
    """Pallas implementation of CrossEntropyAdvLoss.forward.

    Args:
      logits:     [B, K] float array (any float dtype; kept native in HBM).
      targets:    [B] integer array of target class indices.
      mode:       'targeted' -> +CE mean, anything else -> -CE mean.
      block_rows: optional batch tile override (multiple of 8).
    Returns:
      scalar float32 loss.
    """
    B, K = logits.shape

    # --- choose a batch tile ---------------------------------------------
    # Keep double-buffered logits blocks (2 * TB * K * itemsize) around
    # <= 16 MiB so they fit comfortably on every generation (v7x has only
    # 64 MiB physical VMEM), while still being big enough to amortize the
    # ~0.35 us per-grid-step overhead.
    if block_rows is None:
        itemsize = jnp.dtype(logits.dtype).itemsize
        row_bytes = max(K * itemsize, 1)
        tb = (8 * 1024 * 1024) // row_bytes          # ~8 MiB per buffer
        tb = min(512, max(8, tb), _round_up(B, 8))
    else:
        tb = max(8, block_rows)
    tb = max(8, (tb // 8) * 8)

    B_pad = _round_up(B, tb)
    nblocks = B_pad // tb

    targets_2d = targets.astype(jnp.int32).reshape(B, 1)
    logits_p = logits
    if B_pad != B:
        logits_p = jnp.pad(logits, ((0, B_pad - B), (0, 0)))
        targets_2d = jnp.pad(targets_2d, ((0, B_pad - B), (0, 0)))

    kernel = functools.partial(_ce_partial_kernel, valid_rows=B)

    partials = pl.pallas_call(
        kernel,
        out_shape=jax.ShapeDtypeStruct((nblocks, 8, 128), jnp.float32),
        grid=(nblocks,),
        in_specs=[
            pl.BlockSpec((tb, K), lambda i: (i, 0)),   # logits tile (native dtype)
            pl.BlockSpec((tb, 1), lambda i: (i, 0)),   # targets tile
        ],
        out_specs=pl.BlockSpec((1, 8, 128), lambda i: (i, 0, 0)),
        compiler_params=pltpu.CompilerParams(
            dimension_semantics=("parallel",),
            vmem_limit_bytes=32 * 1024 * 1024,
        ),
    )(logits_p, targets_2d)

    total = jnp.sum(partials[:, 0, 0])
    sign = 1.0 if mode.lower() == "targeted" else -1.0
    return sign * total / B


def _reference_loss(logits, targets, mode="targeted"):
    # Pure-JAX reference (matches torch.nn.functional.cross_entropy, mean).
    logp = jax.nn.log_softmax(logits.astype(jnp.float32), axis=-1)
    nll = -jnp.take_along_axis(
        logp, targets.astype(jnp.int32)[:, None], axis=-1)[:, 0]
    loss = jnp.mean(nll)
    return loss if mode.lower() == "targeted" else -loss


if __name__ == "__main__":
    key = jax.random.PRNGKey(0)
    k1, k2, k3, k4 = jax.random.split(key, 4)

    # --- small f32 case, same shape regime as the PyTorch module ---------
    B, K = 4, 10
    logits = jax.random.normal(k1, (B, K), dtype=jnp.float32)
    targets = jax.random.randint(k2, (B,), 0, K, dtype=jnp.int32)

    loss_t = jax.block_until_ready(cross_entropy_adv_loss(logits, targets, mode="targeted"))
    loss_u = jax.block_until_ready(cross_entropy_adv_loss(logits, targets, mode="untargeted"))
    ref_t = _reference_loss(logits, targets, mode="targeted")
    ref_u = _reference_loss(logits, targets, mode="untargeted")
    assert jnp.allclose(loss_t, ref_t, atol=1e-5), (loss_t, ref_t)
    assert jnp.allclose(loss_u, ref_u, atol=1e-5), (loss_u, ref_u)

    # --- bf16 logits, uneven B, forced multi-block grid (padding + parallel)
    B2, K2 = 37, 257
    logits2 = jax.random.normal(k3, (B2, K2), dtype=jnp.bfloat16)
    targets2 = jax.random.randint(k4, (B2,), 0, K2, dtype=jnp.int32)

    loss2 = jax.block_until_ready(
        cross_entropy_adv_loss(logits2, targets2, mode="targeted", block_rows=16))
    ref2 = _reference_loss(logits2, targets2, mode="targeted")
    assert jnp.allclose(loss2, ref2, atol=1e-4, rtol=1e-4), (loss2, ref2)

    loss2u = jax.block_until_ready(
        cross_entropy_adv_loss(logits2, targets2, mode="untargeted", block_rows=16))
    ref2u = _reference_loss(logits2, targets2, mode="untargeted")
    assert jnp.allclose(loss2u, ref2u, atol=1e-4, rtol=1e-4), (loss2u, ref2u)

    print("KERNEL_OK")
</pallas_src>

<mosaic_0001>
module attributes {stable_mosaic.version = 11 : i64} {
  func.func @_ce_partial_kernel(%arg0: i32, %arg1: memref<8x10xf32, #tpu.memory_space<vmem>>, %arg2: memref<8x1xi32, #tpu.memory_space<vmem>>, %arg3: memref<1x8x128xf32, #tpu.memory_space<vmem>>) attributes {dimension_semantics = [#tpu.dimension_semantics<parallel>], iteration_bounds = array<i64: 1>, scalar_prefetch = 0 : i64, scratch_operands = 0 : i64, tpu.core_type = #tpu.core_type<tc>, window_params = [{transform_indices = @transform_0, window_bounds = array<i64: 8, 10>}, {transform_indices = @transform_1, window_bounds = array<i64: 8, 1>}, {transform_indices = @transform_2, window_bounds = array<i64: 1, 8, 128>}]} {
    %c0 = arith.constant 0 : index
    %c0_0 = arith.constant 0 : index
    %0 = vector.load %arg1[%c0, %c0_0] : memref<8x10xf32, #tpu.memory_space<vmem>>, vector<8x10xf32>
    %cst = arith.constant dense<0xFF800000> : vector<8xf32>
    %1 = vector.multi_reduction <maximumf>, %0, %cst [1] : vector<8x10xf32> to vector<8xf32>
    %2 = vector.shape_cast %1 : vector<8xf32> to vector<8x1xf32>
    %3 = vector.broadcast %2 : vector<8x1xf32> to vector<8x10xf32>
    %4 = arith.subf %0, %3 : vector<8x10xf32>
    %5 = math.exp %4 : vector<8x10xf32>
    %cst_1 = arith.constant dense<0.000000e+00> : vector<8xf32>
    %6 = vector.multi_reduction <add>, %5, %cst_1 [1] : vector<8x10xf32> to vector<8xf32>
    %7 = vector.shape_cast %6 : vector<8xf32> to vector<8x1xf32>
    %8 = math.log %7 : vector<8x1xf32>
    %9 = arith.addf %8, %2 : vector<8x1xf32>
    %10 = tpu.iota {dimensions = array<i32: 1>} : vector<8x10xi32>
    %c0_2 = arith.constant 0 : index
    %c0_3 = arith.constant 0 : index
    %11 = vector.load %arg2[%c0_2, %c0_3] : memref<8x1xi32, #tpu.memory_space<vmem>>, vector<8x1xi32>
    %12 = vector.broadcast %11 : vector<8x1xi32> to vector<8x10xi32>
    %13 = arith.cmpi eq, %10, %12 : vector<8x10xi32>
    %cst_4 = arith.constant 0.000000e+00 : f32
    %14 = vector.broadcast %cst_4 : f32 to vector<8x10xf32>
    %15 = arith.select %13, %0, %14 : vector<8x10xi1>, vector<8x10xf32>
    %cst_5 = arith.constant dense<0.000000e+00> : vector<8xf32>
    %16 = vector.multi_reduction <add>, %15, %cst_5 [1] : vector<8x10xf32> to vector<8xf32>
    %17 = vector.shape_cast %16 : vector<8xf32> to vector<8x1xf32>
    %18 = arith.subf %9, %17 : vector<8x1xf32>
    %c8_i32 = arith.constant 8 : i32
    %19 = arith.muli %arg0, %c8_i32 : i32
    %20 = tpu.iota {dimensions = array<i32: 0>} : vector<8x1xi32>
    %21 = vector.broadcast %19 : i32 to vector<8x1xi32>
    %22 = arith.addi %21, %20 : vector<8x1xi32>
    %c4_i32 = arith.constant 4 : i32
    %23 = vector.broadcast %c4_i32 : i32 to vector<8x1xi32>
    %24 = arith.cmpi slt, %22, %23 : vector<8x1xi32>
    %cst_6 = arith.constant 0.000000e+00 : f32
    %25 = vector.broadcast %cst_6 : f32 to vector<8x1xf32>
    %26 = arith.select %24, %18, %25 : vector<8x1xi1>, vector<8x1xf32>
    %27 = vector.shape_cast %26 : vector<8x1xf32> to vector<1x8x1xf32>
    %cst_7 = arith.constant dense<0.000000e+00> : vector<1xf32>
    %28 = vector.multi_reduction <add>, %27, %cst_7 [1, 2] : vector<1x8x1xf32> to vector<1xf32>
    %29 = vector.shape_cast %28 : vector<1xf32> to vector<1x1x1xf32>
    %30 = vector.extract %29[0, 0, 0] : f32 from vector<1x1x1xf32>
    %31 = vector.broadcast %30 : f32 to vector<1x1x1xf32>
    %32 = vector.shape_cast %31 : vector<1x1x1xf32> to vector<1x1x1xf32>
    %33 = vector.broadcast %32 : vector<1x1x1xf32> to vector<1x8x128xf32>
    %c0_8 = arith.constant 0 : index
    %c0_9 = arith.constant 0 : index
    %c0_10 = arith.constant 0 : index
    %34 = vector.load %arg3[%c0_8, %c0_9, %c0_10] : memref<1x8x128xf32, #tpu.memory_space<vmem>>, vector<1x8x128xf32>
    tpu.vector_store %arg3[%c0_8, %c0_9, %c0_10], %33 {strides = array<i32>} : memref<1x8x128xf32, #tpu.memory_space<vmem>>, vector<1x8x128xf32>,
    return
  }
  func.func @transform_0(%arg0: i32) -> (i32, i32) {
    %c0_i32 = arith.constant 0 : i32
    %c0_i32_0 = arith.constant 0 : i32
    return %arg0, %c0_i32 : i32, i32
  }
  func.func @transform_1(%arg0: i32) -> (i32, i32) {
    %c0_i32 = arith.constant 0 : i32
    %c0_i32_0 = arith.constant 0 : i32
    return %arg0, %c0_i32 : i32, i32
  }
  func.func @transform_2(%arg0: i32) -> (i32, i32, i32) {
    %c0_i32 = arith.constant 0 : i32
    %c0_i32_0 = arith.constant 0 : i32
    %c0_i32_1 = arith.constant 0 : i32
    return %arg0, %c0_i32, %c0_i32_0 : i32, i32, i32
  }
}

</mosaic_0001>

<bundles_post_ra>
// kernel: tpu_custom_call.1
= control target key start
LH: loop header
LB: loop body
LE: loop exit
PB: predicated region body
PF: predicated region fallthrough
CT: control target
= control target key end

     0   :  { %vm13_vm0 = vcmask 80896   ;;  %s138_s0 = inlined_call_operand.vmem [shape: f32[8,10], index: 0, kind: input, shape index: {}]   ;;  %s139_s1 = inlined_call_operand.vmem [shape: s32[8,1], index: 1, kind: input, shape index: {}]   ;;  %s140_s2 = inlined_call_operand.hbm [shape: f32[1,8,128], index: 2, kind: output, shape index: {}]  }
   0x1   :  { %v12_v0 = vld [vmem:[%s138_s0] sm:$0xff] }
   0x2   :  { %7 = vsyncpa [#allocation3], 0  ;;  %v14_v1 = vsel %vm13_vm0, %v12_v0, -inf  ;;  %v109_v2 = vmov 0   ;;  %v28_v3 = vld [vmem:[%s139_s1] sm:$0xff]  ;;  %v26_v9 = vlaneseq  ;;  %vm45_vm3 = vcmask 7168  }
   0x3   :  { %78 = vset.pattern.permute.xlu0 %v109_v2  ;;  %s110_s0 = smov [#allocation2]   ;;  %s65_s15 = sshll.u32 %s140_s2, 4  ;;  %s66_s15 = int_to_ptr.hbm [resolvable:$true] %s65_s15 }
   0x4   :  { %15 = vmax.xlane.f32.xlu0 %v14_v1  ;;  %v27_v10 = vand.u32 127, %v26_v9  ;;  %v40_v16 = vshrl.u32 %v26_v9, 7  ;;  %s63_s1 = sshll.u32 %s110_s0, 4  ;;  %s64_s1 = int_to_ptr.vmem [resolvable:$true] %s63_s1 }
   0x6   :  { %vm43_vm2 = vcmp.lt.s32.totalorder %v40_v16, 4 }
  0x18   :  { %30 = vperm.xlu0 %78, %v28_v3  }
  0x77   :  { %v16_v4 = vpop.xlane.xlu0 %15 }
  0x78   :  { %v17_v5 = vsub.f32 %v12_v0, %v16_v4 }
  0x7a   :  { %v18_v6 = vmul.f32 1.442695, %v17_v5 }
  0x7c   :  { %79 = vpow2.f32 %v18_v6 }
  0x82   :  { %v80_v7 = vpop.eup %79 }
  0x83   :  { %v20_v8 = vsel %vm13_vm0, %v80_v7, 0.0 }
  0x84   :  { %21 = vadd.xlane.f32.xlu1 %v20_v8 }
  0x8a   :  { %v31_v11 = vpop.permute.xlu0 %30 }
  0x8b   :  { %vm32_vm1 = vcmp.eq.s32.totalorder %v27_v10, %v31_v11 }
  0x8c   :  { %v33_v12 = vsel %vm32_vm1, %v12_v0, 0.0 }
  0x8d   :  { %v34_v13 = vsel %vm13_vm0, %v33_v12, 0.0 }
  0x8e   :  { %35 = vadd.xlane.f32.xlu1 %v34_v13 }
  0xf7   :  { %v22_v14 = vpop.xlane.xlu1 %21 }
  0xf8   :  { %81 = vlog2.f32 %v22_v14 }
  0xfe   :  { %v82_v15 = vpop.eup %81 }
  0xff   :  { %v24_v17 = vmul.f32 0.6931472, %v82_v15 }
 0x101   :  { %v25_v18 = vadd.f32 %v24_v17, %v16_v4  ;;  %v36_v19 = vpop.xlane.xlu1 %35 }
 0x103   :  { %v37_v20 = vsub.f32 %v25_v18, %v36_v19 }
 0x105   :  { %v44_v21 = vsel %vm43_vm2, %v37_v20, 0.0 }
 0x106   :  { %v46_v22 = vsel %vm45_vm3, %v44_v21, 0.0 }
 0x107   :  { %47 = vadd.xlane.f32.xlu2 %v46_v22 }
 0x17a   :  { %v48_v23 = vpop.xlane.xlu2 %47 }
 0x17b   :  { %v49_v24 = vrot.slane %v48_v23, 4 }
 0x17d   :  { %v50_v25 = vadd.f32 %v49_v24, %v48_v23 }
 0x17f   :  { %v51_v26 = vrot.slane %v50_v25, 2 }
 0x181   :  { %v52_v27 = vadd.f32 %v51_v26, %v50_v25 }
 0x183   :  { %v53_v28 = vrot.slane %v52_v27, 1 }
 0x185   :  { %v54_v29 = vadd.f32 %v53_v28, %v52_v27 }
 0x187   :  { %74 = vpush %v54_v29 }
 0x1b8   :  { %s75_s16 = spop %74 }
 0x1b9   :  { %v56_v30 = vstv %s75_s16 }
 0x1ba   :  { %57 = vst [vmem:[#allocation2] sm:$0xff] %v56_v30 }
 0x1bb   :  { %68 = dma.vmem_to_hbm [thread:$0]  %s64_s1, 128, %s66_s15, [#allocation3]  }
 0x1bc   :  { %107 = dma.done.wait [#allocation3], 128  }
 0x1bd   :  { %108 = vsyncadd [#allocation3], 4294967168 }
 0x1be   :  { %73 = vsyncpa [#allocation3], 1 }

</bundles_post_ra>
